<compile_context>
chip_gen: v7x
topology: tpu7x:2x2x1
jax: 0.10.0
libtpu: 0.0.40
codegen_flags: <defaults>
</compile_context>

<pallas_src>
import jax
import jax.numpy as jnp
from jax.experimental import pallas as pl
from jax.experimental.pallas import tpu as pltpu


def _supact_kernel(x_ref, params_ref, o_ref):
    x = x_ref[...].astype(jnp.float32)        # (tb, tf)
    p = params_ref[...]                       # (2, tf) f32, resident per feature tile
    g = p[0:1, :]                             # (1, tf) gamma
    b = p[1:2, :]                             # (1, tf) beta
    inv = jax.nn.sigmoid(b * x)               # transcendental on the EUP slot
    mult = g + inv * (1.0 - g)                # VPU (idle otherwise)
    o_ref[...] = (mult * x).astype(o_ref.dtype)


def _round_up(n, m):
    return ((n + m - 1) // m) * m


def _sublane_multiple(dtype):
    # f32 -> 8 rows, bf16/fp16 -> 16, int8/fp8 -> 32 (sub-32-bit packs along sublanes).
    itemsize = jnp.dtype(dtype).itemsize
    return max(8, 32 // max(1, itemsize))


def _supact_jnp(x, gamma, beta):
    xf = x.astype(jnp.float32)
    g = gamma.astype(jnp.float32)[None, :]
    b = beta.astype(jnp.float32)[None, :]
    inv = jax.nn.sigmoid(b * xf)
    return ((g + inv * (1.0 - g)) * xf).astype(x.dtype)


def supact(x, gamma, beta, *, tb=None, tf=1024, allow_fast_path=True,
           fast_path_elems=1 << 16):
    """x: (B, F); gamma, beta: (F,). Returns (B, F) of x.dtype."""
    B, F = x.shape

    # Small-shape fast path: pallas_call fixed cost dominates below this size.
    if allow_fast_path and B * F <= fast_path_elems:
        return _supact_jnp(x, gamma, beta)

    itemsize = jnp.dtype(x.dtype).itemsize
    sub = _sublane_multiple(x.dtype)

    # ~4 MiB blocks by default: 1024 f32 rows (2048 bf16, 4096 int8) x 1024 lanes.
    if tb is None:
        tb = 1024 * max(1, 4 // itemsize)

    Bp = _round_up(B, sub)
    Fp = _round_up(F, 128)
    tb = max(sub, min(_round_up(tb, sub), Bp))
    tf = max(128, min(_round_up(tf, 128), Fp))

    # v7x: guarantee >= 2 grid steps so both TensorCores get work.
    if pl.cdiv(B, tb) * pl.cdiv(F, tf) == 1:
        if Bp // sub >= 2:
            tb = _round_up(pl.cdiv(Bp, 2), sub)
        elif Fp // 128 >= 2:
            tf = _round_up(pl.cdiv(Fp, 2), 128)

    # Feature axis slow, batch axis fast: the param block (indexed only by j)
    # stays resident across consecutive batch steps -> one param DMA per tile.
    grid = (pl.cdiv(F, tf), pl.cdiv(B, tb))

    # Single packed parameter stream; (1 - gamma) is recomputed in-kernel.
    params = jnp.stack(
        [gamma.astype(jnp.float32), beta.astype(jnp.float32)], axis=0)  # (2, F)

    return pl.pallas_call(
        _supact_kernel,
        out_shape=jax.ShapeDtypeStruct((B, F), x.dtype),
        grid=grid,
        in_specs=[
            pl.BlockSpec((tb, tf), lambda j, i: (i, j)),   # x tile (ragged edges masked)
            pl.BlockSpec((2, tf), lambda j, i: (0, j)),    # packed gamma/beta, resident
        ],
        out_specs=pl.BlockSpec((tb, tf), lambda j, i: (i, j)),
        compiler_params=pltpu.CompilerParams(
            dimension_semantics=("parallel", "parallel"),
            vmem_limit_bytes=48 * 1024 * 1024,
        ),
    )(x, params)


def supact_ref(x, gamma, beta):
    inv = jax.nn.sigmoid(beta[None, :] * x)
    mult = gamma[None, :] + inv * (1.0 - gamma[None, :])
    return mult * x


if __name__ == "__main__":
    key = jax.random.PRNGKey(0)
    kx, kg, kb, kx2, kx3, kg3, kb3 = jax.random.split(key, 7)

    # Module-native small shape: batch=8, in_size=128 (aligned case).
    B, F = 8, 128
    x = jax.random.normal(kx, (B, F), dtype=jnp.float32)
    # nn.Parameter init is gamma=ones, beta=zeros; perturb so sigmoid is exercised.
    gamma = jnp.ones((F,), jnp.float32) + 0.1 * jax.random.normal(kg, (F,), jnp.float32)
    beta = jnp.zeros((F,), jnp.float32) + 0.1 * jax.random.normal(kb, (F,), jnp.float32)

    out = jax.block_until_ready(supact(x, gamma, beta, allow_fast_path=False))
    ref = supact_ref(x, gamma, beta)
    assert jnp.allclose(out, ref, atol=1e-5, rtol=1e-5), "mismatch (aligned)"

    # Non-(8,128)-aligned shape: ragged edge blocks, no wrapper pad/slice.
    B2, F2 = 10, 200
    x2 = jax.random.normal(kx2, (B2, F2), dtype=jnp.float32)
    gamma2 = jnp.full((F2,), 0.9, jnp.float32)
    beta2 = jnp.full((F2,), 0.05, jnp.float32)
    out2 = jax.block_until_ready(supact(x2, gamma2, beta2, allow_fast_path=False))
    ref2 = supact_ref(x2, gamma2, beta2)
    assert jnp.allclose(out2, ref2, atol=1e-5, rtol=1e-5), "mismatch (ragged)"

    # Multi-tile ragged grid: exercises resident param reuse across batch steps.
    B3, F3 = 40, 600
    x3 = jax.random.normal(kx3, (B3, F3), dtype=jnp.float32)
    gamma3 = jnp.ones((F3,), jnp.float32) + 0.1 * jax.random.normal(kg3, (F3,), jnp.float32)
    beta3 = 0.1 * jax.random.normal(kb3, (F3,), jnp.float32)
    out3 = jax.block_until_ready(
        supact(x3, gamma3, beta3, tb=16, tf=256, allow_fast_path=False))
    ref3 = supact_ref(x3, gamma3, beta3)
    assert jnp.allclose(out3, ref3, atol=1e-5, rtol=1e-5), "mismatch (multi-tile)"

    # bf16 input: f32 internal compute, bf16 store.
    xb = x.astype(jnp.bfloat16)
    outb = jax.block_until_ready(supact(xb, gamma, beta, allow_fast_path=False))
    refb = supact_ref(xb.astype(jnp.float32), gamma, beta)
    assert jnp.allclose(outb.astype(jnp.float32), refb, atol=2e-2, rtol=2e-2), "mismatch (bf16)"

    # Small-shape fast path (pure jnp, bypasses pallas_call fixed cost).
    outf = jax.block_until_ready(supact(x, gamma, beta))
    assert jnp.allclose(outf, ref, atol=1e-5, rtol=1e-5), "mismatch (fast path)"

    print("KERNEL_OK")
</pallas_src>

<mosaic_0001>
module attributes {stable_mosaic.version = 11 : i64} {
  func.func @_supact_kernel(%arg0: i32, %arg1: i32, %arg2: memref<8x128xf32, #tpu.memory_space<vmem>>, %arg3: memref<2x128xf32, #tpu.memory_space<vmem>>, %arg4: memref<8x128xf32, #tpu.memory_space<vmem>>) attributes {dimension_semantics = [#tpu.dimension_semantics<parallel>, #tpu.dimension_semantics<parallel>], iteration_bounds = array<i64: 1, 1>, scalar_prefetch = 0 : i64, scratch_operands = 0 : i64, tpu.core_type = #tpu.core_type<tc>, window_params = [{transform_indices = @transform_0, window_bounds = array<i64: 8, 128>}, {transform_indices = @transform_1, window_bounds = array<i64: 2, 128>}, {transform_indices = @transform_2, window_bounds = array<i64: 8, 128>}]} {
    %c0 = arith.constant 0 : index
    %c0_0 = arith.constant 0 : index
    %0 = vector.load %arg2[%c0, %c0_0] : memref<8x128xf32, #tpu.memory_space<vmem>>, vector<8x128xf32>
    %c0_1 = arith.constant 0 : index
    %c0_2 = arith.constant 0 : index
    %1 = vector.load %arg3[%c0_1, %c0_2] : memref<2x128xf32, #tpu.memory_space<vmem>>, vector<2x128xf32>
    %2 = vector.extract_strided_slice %1 {offsets = [0, 0], sizes = [1, 128], strides = [1, 1]} : vector<2x128xf32> to vector<1x128xf32>
    %3 = vector.extract_strided_slice %1 {offsets = [1, 0], sizes = [1, 128], strides = [1, 1]} : vector<2x128xf32> to vector<1x128xf32>
    %4 = vector.broadcast %3 : vector<1x128xf32> to vector<8x128xf32>
    %5 = arith.mulf %4, %0 : vector<8x128xf32>
    %6 = arith.negf %5 : vector<8x128xf32>
    %7 = math.exp %6 : vector<8x128xf32>
    %cst = arith.constant 1.000000e+00 : f32
    %8 = vector.broadcast %cst : f32 to vector<8x128xf32>
    %9 = arith.addf %8, %7 : vector<8x128xf32>
    %10 = arith.divf %8, %9 : vector<8x128xf32>
    %cst_3 = arith.constant 1.000000e+00 : f32
    %11 = vector.broadcast %cst_3 : f32 to vector<1x128xf32>
    %12 = arith.subf %11, %2 : vector<1x128xf32>
    %13 = vector.broadcast %12 : vector<1x128xf32> to vector<8x128xf32>
    %14 = arith.mulf %10, %13 : vector<8x128xf32>
    %15 = vector.broadcast %2 : vector<1x128xf32> to vector<8x128xf32>
    %16 = arith.addf %15, %14 : vector<8x128xf32>
    %17 = arith.mulf %16, %0 : vector<8x128xf32>
    %c0_4 = arith.constant 0 : index
    %c0_5 = arith.constant 0 : index
    %18 = vector.load %arg4[%c0_4, %c0_5] : memref<8x128xf32, #tpu.memory_space<vmem>>, vector<8x128xf32>
    tpu.vector_store %arg4[%c0_4, %c0_5], %17 {strides = array<i32>} : memref<8x128xf32, #tpu.memory_space<vmem>>, vector<8x128xf32>,
    return
  }
  func.func @transform_0(%arg0: i32, %arg1: i32) -> (i32, i32) {
    %c0_i32 = arith.constant 0 : i32
    return %arg1, %arg0 : i32, i32
  }
  func.func @transform_1(%arg0: i32, %arg1: i32) -> (i32, i32) {
    %c0_i32 = arith.constant 0 : i32
    %c0_i32_0 = arith.constant 0 : i32
    return %c0_i32, %arg0 : i32, i32
  }
  func.func @transform_2(%arg0: i32, %arg1: i32) -> (i32, i32) {
    %c0_i32 = arith.constant 0 : i32
    return %arg1, %arg0 : i32, i32
  }
}

</mosaic_0001>

<bundles_post_ra>
// kernel: tpu_custom_call.1
= control target key start
LH: loop header
LB: loop body
LE: loop exit
PB: predicated region body
PF: predicated region fallthrough
CT: control target
= control target key end

     0   :  { %7 = vsyncpa [#allocation3], 0  ;;  %s164_s0 = inlined_call_operand.hbm [shape: f32[8,128], index: 0, kind: input, shape index: {}]   ;;  %s165_s1 = inlined_call_operand.vmem [shape: f32[2,128], index: 1, kind: input, shape index: {}]   ;;  %s166_s2 = inlined_call_operand.hbm [shape: f32[8,128], index: 2, kind: output, shape index: {}]  }
   0x1   :  { %8 = vsyncpa [#allocation4], 0  ;;  %s120_s9 = smov [#allocation2]   ;;  %s72_s13 = scalar_lea.hbm %s164_s0, 128 }
   0x2   :  { %s15_s10 = sshll.u32 %s120_s9, 4  ;;  %p73_p0 = scmp.ne.s32.totalorder %s164_s0, %s72_s13  ;;  %s16_s10 = int_to_ptr.vmem [resolvable:$true] %s15_s10 }
   0x3   :  { %p76_p1 = scmp.lt.u32.totalorder %s72_s13, %s164_s0 }
   0x5   :  { %p78_p2 = pnand %p76_p1, %p73_p0 }
   0x7   :  { %81 = shalt.err (!%p78_p2)
}
   0x8   :  { %s82_s18 = scalar_lea.vmem %s16_s10, 128  ;;  %p87_p4 = scmp.lt.s32.totalorder %s16_s10, %s16_s10 }
   0x9   :  { %p83_p3 = scmp.ne.s32.totalorder %s16_s10, %s82_s18  ;;  %p88_p5 = scmp.lt.s32.totalorder %s82_s18, %s82_s18 }
   0xb   :  { %p89_p6 = por %p88_p5, %p87_p4 }
   0xd   :  { %p90_p7 = pnand %p89_p6, %p83_p3 }
   0xf   :  { %93 = shalt.err (!%p90_p7)
}
  0x10   :  { %18 = dma.hbm_to_vmem [thread:$0]  %s164_s0, 128, %s16_s10, [#allocation3]  }
  0x11   :  { %116 = dma.done.wait [#allocation3], 128  }
  0x12   :  { %117 = vsyncadd [#allocation3], 4294967168  ;;  %v26_v0 = vlaneseq  ;;  %v24_v3 = vld [vmem:[#allocation2] sm:$0xff]  ;;  %s121_s0 = smov [#allocation5]  }
  0x13   :  { %v25_v4 = vld [vmem:[%s165_s1] sm:$0x3]  ;;  %s56_s23 = sshll.u32 %s121_s0, 4  ;;  %s57_s23 = int_to_ptr.vmem [resolvable:$true] %s56_s23 }
  0x14   :  { %v27_v1 = vshrl.u32 %v26_v0, 7  ;;  %v37_v10 = vsub.f32 1.0, %v25_v4  ;;  %s94_s1 = scalar_lea.vmem %s57_s23, 128  ;;  %p99_p9 = scmp.lt.s32.totalorder %s57_s23, %s57_s23 }
  0x15   :  { %p95_p8 = scmp.ne.s32.totalorder %s57_s23, %s94_s1  ;;  %p100_p10 = scmp.lt.s32.totalorder %s94_s1, %s94_s1 }
  0x16   :  { %v28_v2 = vsub.s32 1, %v27_v1  ;;  %v40_v11 = vsub.s32 0, %v27_v1 }
  0x17   :  { %p101_p11 = por %p100_p10, %p99_p9 }
  0x18   :  { %v29_v5 = vrot.slane %v25_v4, %v28_v2  ;;  %v41_v12 = vrot.slane %v37_v10, %v40_v11  ;;  %v46_v13 = vrot.slane %v25_v4, %v40_v11 }
  0x19   :  { %p102_p12 = pnand %p101_p11, %p95_p8 }
  0x1a   :  { %v30_v6 = vmul.f32 %v29_v5, %v24_v3 }
  0x1c   :  { %v65_v7 = vmul.f32 -1.442695, %v30_v6 }
  0x1e   :  { %68 = vpow2.f32 %v65_v7 }
  0x28   :  { %v69_v8 = vpop.eup %68 }
  0x29   :  { %v34_v9 = vadd.f32 1.0, %v69_v8 }
  0x2b   :  { %70 = vrcp.f32 %v34_v9 }
  0x35   :  { %v71_v14 = vpop.eup %70 }
  0x36   :  { %v42_v15 = vmul.f32 %v71_v14, %v41_v12 }
  0x38   :  { %v47_v16 = vadd.f32 %v46_v13, %v42_v15 }
  0x3a   :  { %v48_v17 = vmul.f32 %v47_v16, %v24_v3 }
  0x3c   :  { %49 = vst [vmem:[#allocation5] sm:$0xff] %v48_v17 }
  0x3d   :  { %105 = shalt.err (!%p102_p12)
}
  0x3e   :  { %s106_s26 = scalar_lea.hbm %s166_s2, 128 }
  0x3f   :  { %p107_p13 = scmp.ne.s32.totalorder %s166_s2, %s106_s26  ;;  %p110_p0 = scmp.lt.u32.totalorder %s106_s26, %s166_s2 }
  0x41   :  { %p112_p1 = pnand %p110_p0, %p107_p13 }
  0x43   :  { %115 = shalt.err (!%p112_p1)
}
  0x44   :  { %59 = dma.vmem_to_hbm [thread:$0]  %s57_s23, 128, %s166_s2, [#allocation4]  }
  0x45   :  { %118 = dma.done.wait [#allocation4], 128  }
  0x46   :  { %119 = vsyncadd [#allocation4], 4294967168 }
  0x47   :  { %63 = vsyncpa [#allocation3], 1 }
  0x48   :  { %64 = vsyncpa [#allocation4], 1 }

</bundles_post_ra>
